<compile_context>
chip_gen: v5e
topology: v5e:2x2
jax: 0.10.0
libtpu: 0.0.40
codegen_flags: <defaults>
</compile_context>

<pallas_src>
import functools

import jax
import jax.numpy as jnp
from jax.experimental import pallas as pl
from jax.experimental.pallas import tpu as pltpu


# ---------------------------------------------------------------------------
# Fused kernel:  (patches @ W)  +  pos_row  ->  LayerNorm  ->  store
# ---------------------------------------------------------------------------
def _fused_embed_kernel(p_ref, w_ref, pos_ref, g_ref, b_ref, o_ref, *, eps):
    # p_ref:   (tm, K)  bf16 patch rows
    # w_ref:   (K, D)   bf16 projection weight (resident across the grid)
    # pos_ref: (tm, D)  f32  per-row additive term (conv_b + temporal + spatial)
    # g_ref/b_ref: (1, D) f32 LayerNorm gamma / beta
    # o_ref:   (tm, D)  output tile
    acc = jnp.dot(p_ref[...], w_ref[...], preferred_element_type=jnp.float32)
    h = acc + pos_ref[...]
    mu = jnp.mean(h, axis=-1, keepdims=True)
    c = h - mu
    var = jnp.mean(c * c, axis=-1, keepdims=True)
    y = c * jax.lax.rsqrt(var + eps)
    y = y * g_ref[...] + b_ref[...]
    o_ref[...] = y.astype(o_ref.dtype)


# ---------------------------------------------------------------------------
# Full forward (4-D data path of VideoBaseEmbedding, eval mode)
# ---------------------------------------------------------------------------
def video_base_embedding_2d(data, conv_w, conv_b, temporal_table, spatial_table,
                            ln_gamma, ln_beta, *, patch_size, time_span=1,
                            spatial_pos_embed_index=0, ln_eps=1e-5):
    if time_span != 1:
        # TODO(synk): time_span > 1 interleaves channels in the rearrange
        # '(b t s) c hw -> b t hw (s c)'; module hard-codes time_span=1.
        raise NotImplementedError("time_span != 1 not implemented")

    B, C, H, W = data.shape
    D = conv_w.shape[0]
    p = patch_size
    hp, wp = H // p, W // p
    hw = hp * wp
    K = C * p * p

    # --- patch extraction (pure layout, done by XLA in the wrapper) ----------
    patches = data.reshape(B, C, hp, p, wp, p)
    patches = patches.transpose(0, 2, 4, 1, 3, 5).reshape(B, hw, K)
    w_mat = conv_w.reshape(D, K).T                                     # (K, D)

    # bf16 matmul inputs, f32 accumulation on the MXU.
    patches_b = patches.astype(jnp.bfloat16)
    w_b = w_mat.astype(jnp.bfloat16)

    # --- precombined per-row additive term (tiny: hw x D) --------------------
    # Divide_ST_POS eval path: temporal ids = arange(T=1), spatial ids =
    # arange(idx, idx + hw).  Conv bias folded in as well.
    # TODO(synk): random_temporal_pos training offset not implemented (eval only).
    spos = jax.lax.dynamic_slice_in_dim(spatial_table, spatial_pos_embed_index,
                                        hw, axis=0)                     # (hw, D)
    pos = (conv_b[None, :].astype(jnp.float32)
           + temporal_table[0][None, :].astype(jnp.float32)
           + spos.astype(jnp.float32))                                  # (hw, D)

    g_row = ln_gamma.reshape(1, D).astype(jnp.float32)
    b_row = ln_beta.reshape(1, D).astype(jnp.float32)

    # --- tiling: fixed 256-row tiles (full extent when hw <= 256) ------------
    tm = hw if hw <= 256 else 256
    n_s = pl.cdiv(hw, tm)

    kernel = functools.partial(_fused_embed_kernel, eps=ln_eps)

    out = pl.pallas_call(
        kernel,
        out_shape=jax.ShapeDtypeStruct((B, hw, D), data.dtype),
        grid=(n_s, B),                                   # pos block idx on slow axis
        in_specs=[
            pl.BlockSpec((None, tm, K), lambda i, b: (b, i, 0)),   # patch rows
            pl.BlockSpec((K, D), lambda i, b: (0, 0)),             # weight (resident)
            pl.BlockSpec((tm, D), lambda i, b: (i, 0)),            # pos rows (DMA elided over b)
            pl.BlockSpec((1, D), lambda i, b: (0, 0)),             # LN gamma
            pl.BlockSpec((1, D), lambda i, b: (0, 0)),             # LN beta
        ],
        out_specs=pl.BlockSpec((None, tm, D), lambda i, b: (b, i, 0)),
        compiler_params=pltpu.CompilerParams(
            dimension_semantics=("parallel", "parallel")),
    )(patches_b, w_b, pos, g_row, b_row)

    return out                                            # (B, hw, D) == flatten(1, 2)


if __name__ == "__main__":
    # Small config consistent with the module structure
    # (real module: C=3, patch=16, D=768, max_time_len=8, hw=max_spatial_size_2D).
    B, C, H, W = 2, 3, 16, 16
    patch_size = 4
    out_dim = 32
    max_time_len = 8
    hp, wp = H // patch_size, W // patch_size
    hw = hp * wp                      # 16 spatial patches
    num_patches_2d = hw               # max_spatial_size_2D

    key = jax.random.PRNGKey(0)
    ks = jax.random.split(key, 7)
    # Quantize matmul inputs to the bf16 grid so the bf16 MXU products are exact
    # and the check against the f32 reference is precision-algorithm independent.
    q = lambda a: a.astype(jnp.bfloat16).astype(jnp.float32)
    data = q(jax.random.normal(ks[0], (B, C, H, W), jnp.float32))
    fan_in = C * patch_size * patch_size
    conv_w = q(jax.random.normal(ks[1], (out_dim, C, patch_size, patch_size),
                                 jnp.float32) / (fan_in ** 0.5))
    conv_b = q(jax.random.normal(ks[2], (out_dim,), jnp.float32) * 0.02)
    spatial_table = q(jax.random.normal(ks[3], (num_patches_2d, out_dim), jnp.float32))
    temporal_table = q(jax.random.normal(ks[4], (max_time_len, out_dim), jnp.float32))
    ln_gamma = q(jax.random.normal(ks[5], (out_dim,), jnp.float32) * 0.1 + 1.0)
    ln_beta = q(jax.random.normal(ks[6], (out_dim,), jnp.float32) * 0.1)

    fwd = jax.jit(functools.partial(video_base_embedding_2d, patch_size=patch_size))
    out = fwd(data, conv_w, conv_b, temporal_table, spatial_table, ln_gamma, ln_beta)
    out = jax.block_until_ready(out)

    # ------------------ pure-JAX reference (mirrors the PyTorch math) --------
    conv_ref = jax.lax.conv_general_dilated(
        data, conv_w, window_strides=(patch_size, patch_size), padding="VALID",
        dimension_numbers=("NCHW", "OIHW", "NCHW"),
        precision=jax.lax.Precision.HIGHEST)
    conv_ref = conv_ref + conv_b[None, :, None, None]              # (B, D, hp, wp)
    emb_ref = conv_ref.reshape(B, out_dim, hw).transpose(0, 2, 1)  # (B, hw, D)
    pos_ref = temporal_table[:1][:, None, :] + spatial_table[:hw][None, :, :]
    h_ref = emb_ref + pos_ref
    mu = h_ref.mean(-1, keepdims=True)
    var = ((h_ref - mu) ** 2).mean(-1, keepdims=True)
    ref = (h_ref - mu) / jnp.sqrt(var + 1e-5) * ln_gamma + ln_beta

    assert out.shape == (B, hw, out_dim), out.shape
    assert out.dtype == data.dtype, out.dtype
    max_err = float(jnp.max(jnp.abs(out - ref)))
    assert jnp.allclose(out, ref, atol=2e-3, rtol=2e-3), f"max_err={max_err}"

    print("KERNEL_OK")
</pallas_src>

<mosaic_0001>
module attributes {stable_mosaic.version = 11 : i64} {
  func.func @_fused_embed_kernel(%arg0: i32, %arg1: i32, %arg2: memref<1x16x48xbf16, #tpu.memory_space<vmem>>, %arg3: memref<48x32xbf16, #tpu.memory_space<vmem>>, %arg4: memref<16x32xf32, #tpu.memory_space<vmem>>, %arg5: memref<1x32xf32, #tpu.memory_space<vmem>>, %arg6: memref<1x32xf32, #tpu.memory_space<vmem>>, %arg7: memref<1x16x32xf32, #tpu.memory_space<vmem>>) attributes {dimension_semantics = [#tpu.dimension_semantics<parallel>, #tpu.dimension_semantics<parallel>], iteration_bounds = array<i64: 1, 2>, scalar_prefetch = 0 : i64, scratch_operands = 0 : i64, tpu.core_type = #tpu.core_type<tc>, window_params = [{transform_indices = @transform_0, window_bounds = array<i64: 1, 16, 48>}, {pipeline_mode = #tpu.pipeline_mode<synchronous>, transform_indices = @transform_1, window_bounds = array<i64: 48, 32>}, {transform_indices = @transform_2, window_bounds = array<i64: 16, 32>}, {pipeline_mode = #tpu.pipeline_mode<synchronous>, transform_indices = @transform_3, window_bounds = array<i64: 1, 32>}, {pipeline_mode = #tpu.pipeline_mode<synchronous>, transform_indices = @transform_4, window_bounds = array<i64: 1, 32>}, {transform_indices = @transform_5, window_bounds = array<i64: 1, 16, 32>}]} {
    %c0 = arith.constant 0 : index
    %c0_0 = arith.constant 0 : index
    %c0_1 = arith.constant 0 : index
    %0 = vector.load %arg2[%c0, %c0_0, %c0_1] : memref<1x16x48xbf16, #tpu.memory_space<vmem>>, vector<1x16x48xbf16>
    %1 = vector.shape_cast %0 : vector<1x16x48xbf16> to vector<16x48xbf16>
    %c0_2 = arith.constant 0 : index
    %c0_3 = arith.constant 0 : index
    %2 = vector.load %arg3[%c0_2, %c0_3] : memref<48x32xbf16, #tpu.memory_space<vmem>>, vector<48x32xbf16>
    %cst = arith.constant dense<0.000000e+00> : vector<16x32xf32>
    %3 = tpu.matmul %1, %2, %cst {dimension_numbers = #tpu.dot_dimension_numbers<[1], [0], [0], [1], [0, 0, 1, 1], [], []>} : vector<16x48xbf16>, vector<48x32xbf16>, vector<16x32xf32> -> vector<16x32xf32>
    %c0_4 = arith.constant 0 : index
    %c0_5 = arith.constant 0 : index
    %4 = vector.load %arg4[%c0_4, %c0_5] : memref<16x32xf32, #tpu.memory_space<vmem>>, vector<16x32xf32>
    %5 = arith.addf %3, %4 : vector<16x32xf32>
    %cst_6 = arith.constant dense<0.000000e+00> : vector<16xf32>
    %6 = vector.multi_reduction <add>, %5, %cst_6 [1] : vector<16x32xf32> to vector<16xf32>
    %7 = vector.shape_cast %6 : vector<16xf32> to vector<16x1xf32>
    %cst_7 = arith.constant 3.200000e+01 : f32
    %8 = vector.broadcast %cst_7 : f32 to vector<16x1xf32>
    %9 = arith.divf %7, %8 : vector<16x1xf32>
    %10 = vector.broadcast %9 : vector<16x1xf32> to vector<16x32xf32>
    %11 = arith.subf %5, %10 : vector<16x32xf32>
    %12 = arith.mulf %11, %11 : vector<16x32xf32>
    %cst_8 = arith.constant dense<0.000000e+00> : vector<16xf32>
    %13 = vector.multi_reduction <add>, %12, %cst_8 [1] : vector<16x32xf32> to vector<16xf32>
    %14 = vector.shape_cast %13 : vector<16xf32> to vector<16x1xf32>
    %cst_9 = arith.constant 3.200000e+01 : f32
    %15 = vector.broadcast %cst_9 : f32 to vector<16x1xf32>
    %16 = arith.divf %14, %15 : vector<16x1xf32>
    %cst_10 = arith.constant 9.99999974E-6 : f32
    %17 = vector.broadcast %cst_10 : f32 to vector<16x1xf32>
    %18 = arith.addf %16, %17 : vector<16x1xf32>
    %19 = math.rsqrt %18 : vector<16x1xf32>
    %20 = vector.broadcast %19 : vector<16x1xf32> to vector<16x32xf32>
    %21 = arith.mulf %11, %20 : vector<16x32xf32>
    %c0_11 = arith.constant 0 : index
    %c0_12 = arith.constant 0 : index
    %22 = vector.load %arg5[%c0_11, %c0_12] : memref<1x32xf32, #tpu.memory_space<vmem>>, vector<1x32xf32>
    %23 = vector.broadcast %22 : vector<1x32xf32> to vector<16x32xf32>
    %24 = arith.mulf %21, %23 : vector<16x32xf32>
    %c0_13 = arith.constant 0 : index
    %c0_14 = arith.constant 0 : index
    %25 = vector.load %arg6[%c0_13, %c0_14] : memref<1x32xf32, #tpu.memory_space<vmem>>, vector<1x32xf32>
    %26 = vector.broadcast %25 : vector<1x32xf32> to vector<16x32xf32>
    %27 = arith.addf %24, %26 : vector<16x32xf32>
    %c0_15 = arith.constant 0 : index
    %c0_16 = arith.constant 0 : index
    %c0_17 = arith.constant 0 : index
    %28 = vector.load %arg7[%c0_15, %c0_16, %c0_17] : memref<1x16x32xf32, #tpu.memory_space<vmem>>, vector<1x16x32xf32>
    %29 = vector.shape_cast %28 : vector<1x16x32xf32> to vector<16x32xf32>
    %30 = vector.shape_cast %27 : vector<16x32xf32> to vector<1x16x32xf32>
    tpu.vector_store %arg7[%c0_15, %c0_16, %c0_17], %30 {strides = array<i32>} : memref<1x16x32xf32, #tpu.memory_space<vmem>>, vector<1x16x32xf32>,
    return
  }
  func.func @transform_0(%arg0: i32, %arg1: i32) -> (i32, i32, i32) {
    %c0_i32 = arith.constant 0 : i32
    %c0_i32_0 = arith.constant 0 : i32
    return %arg1, %arg0, %c0_i32 : i32, i32, i32
  }
  func.func @transform_1(%arg0: i32, %arg1: i32) -> (i32, i32) {
    %c0_i32 = arith.constant 0 : i32
    %c0_i32_0 = arith.constant 0 : i32
    %c0_i32_1 = arith.constant 0 : i32
    return %c0_i32, %c0_i32_0 : i32, i32
  }
  func.func @transform_2(%arg0: i32, %arg1: i32) -> (i32, i32) {
    %c0_i32 = arith.constant 0 : i32
    %c0_i32_0 = arith.constant 0 : i32
    return %arg0, %c0_i32 : i32, i32
  }
  func.func @transform_3(%arg0: i32, %arg1: i32) -> (i32, i32) {
    %c0_i32 = arith.constant 0 : i32
    %c0_i32_0 = arith.constant 0 : i32
    %c0_i32_1 = arith.constant 0 : i32
    return %c0_i32, %c0_i32_0 : i32, i32
  }
  func.func @transform_4(%arg0: i32, %arg1: i32) -> (i32, i32) {
    %c0_i32 = arith.constant 0 : i32
    %c0_i32_0 = arith.constant 0 : i32
    %c0_i32_1 = arith.constant 0 : i32
    return %c0_i32, %c0_i32_0 : i32, i32
  }
  func.func @transform_5(%arg0: i32, %arg1: i32) -> (i32, i32, i32) {
    %c0_i32 = arith.constant 0 : i32
    %c0_i32_0 = arith.constant 0 : i32
    return %arg1, %arg0, %c0_i32 : i32, i32, i32
  }
}

</mosaic_0001>

<bundles_post_ra>
// kernel: video_base_embedding_2d.1
= control target key start
LH: loop header
LB: loop body
LE: loop exit
PB: predicated region body
PF: predicated region fallthrough
CT: control target
= control target key end

     0   :  { %10 = vsyncpa [#allocation3], 0  ;;  %s846_s0 = inlined_call_operand.vmem [shape: bf16[2,16,48], index: 0, kind: input, shape index: {}]   ;;  %s847_s1 = inlined_call_operand.vmem [shape: bf16[48,32], index: 1, kind: input, shape index: {}]   ;;  %s848_s2 = inlined_call_operand.vmem [shape: f32[16,32], index: 2, kind: input, shape index: {}]   ;;  %s849_s3 = inlined_call_operand.vmem [shape: f32[1,32], index: 3, kind: input, shape index: {}]   ;;  %s850_s4 = inlined_call_operand.vmem [shape: f32[1,32], index: 4, kind: input, shape index: {}]   ;;  %s851_s5 = inlined_call_operand.hbm [shape: f32[2,16,32], index: 5, kind: output, shape index: {}]  }
   0x1   :  { %12 = vsyncpa [#allocation3 + $0x1], 0  ;;  %s722_s18 = smov 0   ;;  %s724_s19 = smov 0  }
   0x2   :  { %s726_s20 = smov 0   ;;  %s728_s21 = smov 0  }
   0x3   :  { %s730_s22 = smov 0   ;;  %s732_s23 = smov 0  }
   0x4 LB: > { %s506_s24 = sadd.s32 4294967295, %s687_s23   ;;  %s507_s25 = sadd.s32 4294967294, %s687_s23   ;;  %s687_s23 = sphi %s732_s23, %s18_s23   ;;  %s683_s22 = sphi %s730_s22, %s858_s22   ;;  %s679_s21 = sphi %s728_s21, %s857_s21   ;;  %s675_s20 = sphi %s726_s20, %s856_s20   ;;  %s671_s19 = sphi %s724_s19, %s855_s19   ;;  %s667_s18 = sphi %s722_s18, %s854_s18  }
   0x5   : > { %s27_s26 = sadd.s32 1, %s683_s22  ;;  %s156_s27 = sadd.s32 1, %s675_s20 }
   0x6   : > { %p28_p0 = scmp.ge.s32.totalorder %s27_s26, 2  ;;  %p166_p1 = scmp.ne.s32.totalorder %s675_s20, %s671_s19 }
   0x7   : > { %p167_p2 = scmp.eq.s32.totalorder %s506_s24, 1  ;;  %p172_p3 = scmp.ne.s32.totalorder %s671_s19, %s667_s18 }
   0x8   : > { %s860_s26 = smov (%p28_p0, %s27_s26), 0  ;;  %p173_p5 = scmp.eq.s32.totalorder %s507_s25, 1 }
   0x9   : > { %p762_p4 = por %p167_p2, %p166_p1  ;;  %s151_s29 = ssub.s32 %s683_s22, %s860_s26 }
   0xa   : > { %p511_p6 = scmp.ge.s32.totalorder %s687_s23, 1  ;;  %p154_p7 = scmp.eq.s32.totalorder %s151_s29, 0 }
   0xb   : > { %p769_p8 = por %p173_p5, %p172_p3  ;;  %p222_p9 = scmp.lt.s32.totalorder %s687_s23, 3 }
   0xc   : > { %s775_s6 = scalar_select %p154_p7, %s675_s20, %s156_s27  }
   0xd   : > { %p223_p10 = pnand %p511_p6, %p222_p9 }
   0xe   : > { %p260_p11 = scmp.lt.s32.totalorder (!%p223_p10), %s679_s21, 1  ;;  %s256_s7 = sand.u32 (!%p223_p10), 1, %s671_s19  }
   0xf   : > { %226 = sbr.rel (%p223_p10) target bundleno = 440 (0x1b8), region = 40  ;;  %s542_s13 = sshll.u32 (!%p223_p10), %s679_s21, 4 }
  0x10   : > { %s408_s16 = scalar_lea.hbm (!%p223_p10), %s851_s5, %s542_s13  ;;  %s629_s10 = scalar_lea.hbm (!%p223_p10), %s851_s5, 32 }
  0x11   : > { %s411_s25 = sshll.u32 (!%p223_p10), %s408_s16, 4  ;;  %s412_s25 = int_to_ptr.hbm [resolvable:$true] %s411_s25 }
  0x12   : > { %s623_s27 = sshra.s32 (!%p223_p10), %s412_s25, 4  ;;  %s624_s27 = int_to_ptr.hbm [resolvable:$true] %s623_s27 }
  0x13   : > { %s625_s29 = scalar_lea.hbm (!%p223_p10), %s624_s27, 16  ;;  %p630_p1 = scmp.lt.s32.totalorder (!%p223_p10), %s624_s27, %s851_s5 }
  0x14   : > { %v541_v0 = vld [vmem:[%s847_s1 + $0x10] sm:$0xff]  ;;  %v540_v1 = vld [vmem:[%s847_s1 + $0x8] sm:$0xff]  ;;  %s261_s11 = scalar_select %p260_p11, %s679_s21, 1  ;;  %v539_v2 = vld [vmem:[%s847_s1] sm:$0xff]  ;;  %vm310_vm0 = vcmask 392192   ;;  %vm328_vm1 = vcmask 261120  }
  0x15   : > { %319 = vmatpush.bf16.msra.mxu0 %v541_v0  ;;  %v285_v4 = vld [vmem:[%s848_s2] sm:$0xff]  ;;  %v286_v8 = vld [vmem:[%s848_s2 + $0x8] sm:$0xff]  ;;  %v689_v12 = vmov 32.0   ;;  %s395_s21 = scalar_lea.sflag [#allocation3], %s256_s7  ;;  %p626_p12 = scmp.ne.s32.totalorder %s624_s27, %s625_s29 }
  0x16   : > { %s537_s12 = sshll.u32 %s261_s11, 3  ;;  %603 = vrcp.f32 %v689_v12  ;;  %v601_v43 = vld [vmem:[%s849_s3] ss:$0 sm:$0xff]  ;;  %p631_p2 = scmp.lt.s32.totalorder %s629_s10, %s625_s29 }
  0x17   : > { %s267_s17 = scalar_lea.vmem %s846_s0, %s537_s12  ;;  %v602_v46 = vld [vmem:[%s850_s4] ss:$0 sm:$0xff]  ;;  %s512_s12 = sshll.u32 %s256_s7, 4 }
  0x18   : > { %v538_v3 = vld [vmem:[%s267_s17] sm:$0xff]  ;;  %s258_s17 = scalar_lea.vmem [#allocation2], %s512_s12  ;;  %p627_p13 = pnand %p626_p12, %p762_p4 }
  0x19   : > { %320 = vmatpush.bf16.msra.mxu0 %v540_v1  ;;  %s409_s24 = sshll.u32 %s258_s17, 4  ;;  %p632_p3 = por %p631_p2, %p630_p1  ;;  %s410_s24 = int_to_ptr.vmem [resolvable:$true] %s409_s24 }
  0x1a   : > { %p628_p0 = pneg %p627_p13 }
  0x1c   : > { %v604_v13 = vpop.eup %603  ;;  %p633_p5 = pnand %p632_p3, %p628_p0 }
  0x1d   : > { %321 = vmatpush.bf16.msra.mxu0 %v539_v2  ;;  %v336_v14 = vmul.f32 32.0, %v604_v13  ;;  %vm340_vm2 = vweird.f32 %v604_v13 }
  0x1f   : > { %v337_v15 = vsub.f32 1.0, %v336_v14 }
  0x20   : > { %531 = vmatmul.msk.bf16.vlgmr.msra.gmra.mxu0 %vm310_vm0, %v538_v3 }
  0x21   : > { %v338_v16 = vmul.f32 %v604_v13, %v337_v15 }
  0x23   : > { %v339_v17 = vadd.f32 %v604_v13, %v338_v16 }
  0x25   : > { %v341_v18 = vsel %vm340_vm2, %v604_v13, %v339_v17 }
  0x9d   : > { %v323_v5 = vpop.f32.mrf.mxu0 }
  0x9e   : > { %v324_v6 = vadd.f32 %v323_v5, %v285_v4 }
  0xa0   : > { %v329_v7 = vsel %vm328_vm1, %v324_v6, 0.0 }
  0xa1   : > { %330 = vadd.xlane.f32.xlu0 %v329_v7 }
  0xa5   : > { %v325_v9 = vpop.f32.mrf.mxu0 }
  0xa6   : > { %v326_v10 = vadd.f32 %v325_v9, %v286_v8 }
  0xa8   : > { %v332_v11 = vsel %vm328_vm1, %v326_v10, 0.0 }
  0xa9   : > { %333 = vadd.xlane.f32.xlu0 %v332_v11 }
 0x114   : > { %v331_v19 = vpop.xlane.xlu0 %330 }
 0x115   : > { %v342_v20 = vmul.f32 %v341_v18, %v331_v19 }
 0x117   : > { %v344_v21 = vsub.f32 %v324_v6, %v342_v20 }
 0x119   : > { %v346_v22 = vmul.f32 %v344_v21, %v344_v21 }
 0x11b   : > { %v348_v23 = vsel %vm328_vm1, %v346_v22, 0.0 }
 0x11c   : > { %349 = vadd.xlane.f32.xlu1 %v348_v23  ;;  %v334_v24 = vpop.xlane.xlu0 %333 }
 0x11d   : > { %v343_v25 = vmul.f32 %v341_v18, %v334_v24 }
 0x11f   : > { %v345_v26 = vsub.f32 %v326_v10, %v343_v25 }
 0x121   : > { %v347_v27 = vmul.f32 %v345_v26, %v345_v26 }
 0x123   : > { %v351_v28 = vsel %vm328_vm1, %v347_v27, 0.0 }
 0x124   : > { %352 = vadd.xlane.f32.xlu1 %v351_v28 }
 0x18f   : > { %v350_v29 = vpop.xlane.xlu1 %349 }
 0x190   : > { %v354_v30 = vmul.f32 %v350_v29, %v341_v18 }
 0x192   : > { %v356_v31 = vadd.f32 1e-05, %v354_v30 }
 0x194   : > { %605 = vrsqrt.f32 %v356_v31  ;;  %vm364_vm4 = vweird.f32 %v356_v31 }
 0x197   : > { %v353_v32 = vpop.xlane.xlu1 %352 }
 0x198   : > { %v355_v33 = vmul.f32 %v353_v32, %v341_v18 }
 0x19a   : > { %v606_v34 = vpop.eup %605  ;;  %v357_v35 = vadd.f32 1e-05, %v355_v33 }
 0x19b   : > { %v359_v36 = vmul.f32 %v606_v34, %v356_v31  ;;  %vm365_vm3 = vweird.f32 %v606_v34 }
 0x19c   : > { %607 = vrsqrt.f32 %v357_v35  ;;  %vm366_vm5 = vmor %vm364_vm4, %vm365_vm3  ;;  %vm374_vm7 = vweird.f32 %v357_v35 }
 0x19d   : > { %v360_v37 = vmul.f32 %v606_v34, %v359_v36 }
 0x19f   : > { %v361_v38 = vmul.f32 0.5, %v360_v37 }
 0x1a1   : > { %v362_v39 = vsub.f32 1.5, %v361_v38 }
 0x1a2   : > { %v608_v40 = vpop.eup %607 }
 0x1a3   : > { %v363_v41 = vmul.f32 %v606_v34, %v362_v39  ;;  %v369_v42 = vmul.f32 %v608_v40, %v357_v35  ;;  %vm375_vm6 = vweird.f32 %v608_v40 }
 0x1a4   : > { %vm376_vm8 = vmor %vm374_vm7, %vm375_vm6 }
 0x1a5   : > { %v367_v44 = vsel %vm366_vm5, %v606_v34, %v363_v41  ;;  %v370_v45 = vmul.f32 %v608_v40, %v369_v42 }
 0x1a6   : > { %v378_v47 = vmul.f32 %v367_v44, %v344_v21 }
 0x1a7   : > { %v371_v48 = vmul.f32 0.5, %v370_v45 }
 0x1a8   : > { %v384_v49 = vmul.f32 %v601_v43, %v378_v47 }
 0x1a9   : > { %v372_v50 = vsub.f32 1.5, %v371_v48 }
 0x1aa   : > { %v390_v51 = vadd.f32 %v602_v46, %v384_v49 }
 0x1ab   : > { %v373_v52 = vmul.f32 %v608_v40, %v372_v50 }
 0x1ac   : > { %392 = vst.msk [vmem:[%s258_s17] sm:$0xff] %vm328_vm1, %v390_v51 }
 0x1ad   : > { %v377_v53 = vsel %vm376_vm8, %v608_v40, %v373_v52 }
 0x1ae   : > { %v379_v54 = vmul.f32 %v377_v53, %v345_v26 }
 0x1b0   : > { %v385_v55 = vmul.f32 %v601_v43, %v379_v54 }
 0x1b2   : > { %v391_v56 = vadd.f32 %v602_v46, %v385_v55 }
 0x1b4   : > { %393 = vst.msk [vmem:[%s258_s17 + $0x8] sm:$0xff] %vm328_vm1, %v391_v56 }
 0x1b5   : > { %636 = shalt.err (!%p633_p5)
}
 0x1b6   : > { %s690_s7 = smov 128   ;;  %s691_s13 = smov 8  }
 0x1b7   : > { %543 = dma.vmem_to_hbm [thread:$0]  (%p762_p4), %s410_s24, 256, %s412_s25, %s395_s21, %s690_s7, %s690_s7, %s691_s13  }
 0x1b8 PF: > { %p549_p6 = scmp.ge.s32.totalorder %s687_s23, 2  ;;  %s426_s14 = sand.u32 1, %s667_s18  }
 0x1b9   : > { %s427_s15 = scalar_lea.sflag [#allocation3], %s426_s14 }
 0x1ba   : > { %p546_p7 = pnand %p549_p6, %p769_p8 }
 0x1bc   : > { %p547_p9 = pneg %p546_p7 }
 0x1be   : > { %662 = dma.done.wait (%p547_p9), %s427_s15, 256  }
 0x1bf   : > { %664 = vsyncadd (%p547_p9), %s427_s15, 4294967040  ;;  %s18_s23 = sadd.s32 1, %s687_s23   ;;  %s854_s18 = smov %s671_s19 }
 0x1c0   : > { %p15_p10 = scmp.ge.s32.totalorder %s18_s23, 4   ;;  %s855_s19 = smov %s675_s20 }
 0x1c1   : > { %s856_s20 = smov %s775_s6  ;;  %s857_s21 = smov %s683_s22 }
 0x1c2   : > { %s858_s22 = smov %s860_s26  ;;  %17 = sbr.rel (!%p15_p10) target bundleno = 4 (0x4), region = 78 }
 0x1c7   :  { %433 = vsyncpa [#allocation3], 1 }
 0x1c8   :  { %435 = vsyncpa [#allocation3 + $0x1], 1 }

</bundles_post_ra>
